<compile_context>
chip_gen: v7x
topology: tpu7x:2x2x1
jax: 0.10.0
libtpu: 0.0.40
codegen_flags: <defaults>
</compile_context>

<pallas_src>
import jax
import jax.numpy as jnp
from jax.experimental import pallas as pl
from jax.experimental.pallas import tpu as pltpu


LANE = 128       # lane-dense padding for the class dimension
ROW_TILE = 256   # MXU-friendly row / reduction tile for the propagation matmuls


def _round_up(x, m):
    return (x + m - 1) // m * m


# ---------------------------------------------------------------------------
# Kernel 1: feature transform  H0 = X @ W   ([N_pad, F] @ [F, C_pad])
# Applied before propagation so the expensive N^2 matmuls act on the narrow
# [N_pad, C_pad] matrix.
# ---------------------------------------------------------------------------
def feature_transform_kernel(x_ref, w_ref, o_ref):
    o_ref[...] = jnp.dot(
        x_ref[...], w_ref[...], preferred_element_type=jnp.float32
    ).astype(o_ref.dtype)


def feature_transform(x_bf, w_bf, *, tm):
    n_pad, f = x_bf.shape
    c_pad = w_bf.shape[1]
    return pl.pallas_call(
        feature_transform_kernel,
        out_shape=jax.ShapeDtypeStruct((n_pad, c_pad), jnp.bfloat16),
        grid=(n_pad // tm,),
        in_specs=[
            pl.BlockSpec((tm, f), lambda i: (i, 0)),
            pl.BlockSpec((f, c_pad), lambda i: (0, 0)),
        ],
        out_specs=pl.BlockSpec((tm, c_pad), lambda i: (i, 0)),
        compiler_params=pltpu.CompilerParams(
            dimension_semantics=("parallel",)
        ),
        cost_estimate=pl.CostEstimate(
            flops=2 * n_pad * f * c_pad,
            transcendentals=0,
            bytes_accessed=(n_pad * f + f * c_pad + n_pad * c_pad) * 2,
        ),
    )(x_bf, w_bf)


# ---------------------------------------------------------------------------
# Kernel 2: one propagation step  O = A_hat @ H  (tiled, f32 VMEM accumulator)
# Optional f32 bias epilogue on the final reduction step (v5e-safe f32 VPU add).
# ---------------------------------------------------------------------------
def propagate_kernel(a_ref, h_ref, o_ref, acc_ref):
    k = pl.program_id(1)

    @pl.when(k == 0)
    def _():
        acc_ref[...] = jnp.zeros_like(acc_ref)

    acc_ref[...] += jnp.dot(
        a_ref[...], h_ref[...], preferred_element_type=jnp.float32
    )

    @pl.when(k == pl.num_programs(1) - 1)
    def _():
        o_ref[...] = acc_ref[...].astype(o_ref.dtype)


def propagate_bias_kernel(a_ref, h_ref, b_ref, o_ref, acc_ref):
    k = pl.program_id(1)

    @pl.when(k == 0)
    def _():
        acc_ref[...] = jnp.zeros_like(acc_ref)

    acc_ref[...] += jnp.dot(
        a_ref[...], h_ref[...], preferred_element_type=jnp.float32
    )

    @pl.when(k == pl.num_programs(1) - 1)
    def _():
        o_ref[...] = (acc_ref[...] + b_ref[...]).astype(o_ref.dtype)


def propagate(a_bf, h_bf, bias=None, *, out_dtype, tm, tk):
    n_pad = a_bf.shape[0]
    c_pad = h_bf.shape[1]
    grid = (n_pad // tm, n_pad // tk)

    in_specs = [
        pl.BlockSpec((tm, tk), lambda i, k: (i, k)),       # A row/reduction tile
        pl.BlockSpec((tk, c_pad), lambda i, k: (k, 0)),    # narrow H tile
    ]
    args = [a_bf, h_bf]
    if bias is not None:
        in_specs.append(pl.BlockSpec((1, c_pad), lambda i, k: (0, 0)))
        args.append(bias)
        kernel = propagate_bias_kernel
    else:
        kernel = propagate_kernel

    out_itemsize = jnp.dtype(out_dtype).itemsize
    bytes_accessed = (
        n_pad * n_pad * 2                          # A (bf16), dominant term
        + grid[0] * n_pad * c_pad * 2              # H tiles (bf16), re-fetched per row tile
        + n_pad * c_pad * out_itemsize             # output
    )

    return pl.pallas_call(
        kernel,
        out_shape=jax.ShapeDtypeStruct((n_pad, c_pad), out_dtype),
        grid=grid,
        in_specs=in_specs,
        out_specs=pl.BlockSpec((tm, c_pad), lambda i, k: (i, 0)),
        scratch_shapes=[pltpu.VMEM((tm, c_pad), jnp.float32)],
        compiler_params=pltpu.CompilerParams(
            dimension_semantics=("parallel", "arbitrary")
        ),
        cost_estimate=pl.CostEstimate(
            flops=2 * n_pad * n_pad * c_pad,
            transcendentals=0,
            bytes_accessed=bytes_accessed,
        ),
    )(*args)


# ---------------------------------------------------------------------------
# Wrapper: pad, cast to bf16, run the three Pallas stages, slice back.
# ---------------------------------------------------------------------------
def sgc_forward(a_hat, x, w, b):
    """SGC k=2 forward: A_hat @ (A_hat @ (X @ W)) + b (associativity-reordered)."""
    n, f = x.shape
    c = w.shape[1]

    tile = ROW_TILE
    n_pad = _round_up(n, tile)
    c_pad = _round_up(max(c, LANE), LANE)

    # Zero padding: padded A rows/cols, X rows and W/bias cols are zero, so they
    # contribute nothing to the valid region and are sliced off at the end.
    a_p = jnp.zeros((n_pad, n_pad), jnp.float32).at[:n, :n].set(a_hat)
    x_p = jnp.zeros((n_pad, f), jnp.float32).at[:n, :].set(x)
    w_p = jnp.zeros((f, c_pad), jnp.float32).at[:, :c].set(w)
    b_p = jnp.zeros((1, c_pad), jnp.float32).at[0, :c].set(b)

    # bf16 operands for the MXU; accumulation stays f32 inside the kernels.
    a_bf = a_p.astype(jnp.bfloat16)
    x_bf = x_p.astype(jnp.bfloat16)
    w_bf = w_p.astype(jnp.bfloat16)

    h0 = feature_transform(x_bf, w_bf, tm=tile)                         # [N_pad, C_pad] bf16
    h1 = propagate(a_bf, h0, out_dtype=jnp.bfloat16, tm=tile, tk=tile)  # A @ H0
    out = propagate(a_bf, h1, bias=b_p, out_dtype=jnp.float32,
                    tm=tile, tk=tile)                                   # A @ H1 + b
    return out[:n, :c]


# TODO(synk): real DGLGraph sparse message passing is represented here as a dense
# normalized adjacency; a block-sparse formulation (scalar-prefetched neighbor
# offsets) would be needed for large sparse graphs.
def build_normalized_adjacency(key, n):
    """Random undirected graph, add self loops, symmetric normalisation."""
    raw = jax.random.uniform(key, (n, n))
    adj = (raw + raw.T) * 0.5 > 0.7
    adj = adj.astype(jnp.float32)
    adj = adj + jnp.eye(n, dtype=jnp.float32)   # self loops
    deg = jnp.sum(adj, axis=1)
    d_inv_sqrt = jnp.where(deg > 0, 1.0 / jnp.sqrt(deg), 0.0)
    return adj * d_inv_sqrt[:, None] * d_inv_sqrt[None, :]


if __name__ == "__main__":
    # Small, module-consistent shapes: N graph nodes, in_size features, num_classes.
    N = 64
    IN_SIZE = 32
    NUM_CLASSES = 8

    key = jax.random.PRNGKey(0)
    k_adj, k_x, k_w, k_b = jax.random.split(key, 4)

    a_hat = build_normalized_adjacency(k_adj, N)
    x = jax.random.normal(k_x, (N, IN_SIZE), dtype=jnp.float32)

    # nn.Linear(in_size, num_classes): PyTorch W is [C, F]; we store W^T: [F, C].
    bound = 1.0 / jnp.sqrt(jnp.float32(IN_SIZE))
    w_t = jax.random.uniform(
        k_w, (IN_SIZE, NUM_CLASSES), minval=-bound, maxval=bound, dtype=jnp.float32
    )
    bias = jax.random.uniform(
        k_b, (NUM_CLASSES,), minval=-bound, maxval=bound, dtype=jnp.float32
    )

    out = sgc_forward(a_hat, x, w_t, bias)
    out = jax.block_until_ready(out)

    # Reference: same bf16 input rounding, f32 matmuls, same reordered formula.
    a_r = a_hat.astype(jnp.bfloat16).astype(jnp.float32)
    x_r = x.astype(jnp.bfloat16).astype(jnp.float32)
    w_r = w_t.astype(jnp.bfloat16).astype(jnp.float32)
    h_r = (x_r @ w_r).astype(jnp.bfloat16).astype(jnp.float32)
    h_r = (a_r @ h_r).astype(jnp.bfloat16).astype(jnp.float32)
    ref = a_r @ h_r + bias[None, :]

    assert out.shape == (N, NUM_CLASSES)
    assert jnp.allclose(out, ref, atol=2e-2, rtol=2e-2), "mismatch vs reference"

    print("KERNEL_OK")
</pallas_src>

<mosaic_0001>
module attributes {stable_mosaic.version = 11 : i64} {
  func.func @feature_transform_kernel(%arg0: i32, %arg1: memref<256x32xbf16, #tpu.memory_space<vmem>>, %arg2: memref<32x128xbf16, #tpu.memory_space<vmem>>, %arg3: memref<256x128xbf16, #tpu.memory_space<vmem>>) attributes {dimension_semantics = [#tpu.dimension_semantics<parallel>], iteration_bounds = array<i64: 1>, scalar_prefetch = 0 : i64, scratch_operands = 0 : i64, tpu.core_type = #tpu.core_type<tc>, window_params = [{transform_indices = @transform_0, window_bounds = array<i64: 256, 32>}, {pipeline_mode = #tpu.pipeline_mode<synchronous>, transform_indices = @transform_1, window_bounds = array<i64: 32, 128>}, {transform_indices = @transform_2, window_bounds = array<i64: 256, 128>}]} {
    %c0 = arith.constant 0 : index
    %c0_0 = arith.constant 0 : index
    %0 = vector.load %arg1[%c0, %c0_0] : memref<256x32xbf16, #tpu.memory_space<vmem>>, vector<256x32xbf16>
    %c0_1 = arith.constant 0 : index
    %c0_2 = arith.constant 0 : index
    %1 = vector.load %arg2[%c0_1, %c0_2] : memref<32x128xbf16, #tpu.memory_space<vmem>>, vector<32x128xbf16>
    %cst = arith.constant dense<0.000000e+00> : vector<256x128xf32>
    %2 = tpu.matmul %0, %1, %cst {dimension_numbers = #tpu.dot_dimension_numbers<[1], [0], [0], [1], [0, 0, 1, 1], [], []>} : vector<256x32xbf16>, vector<32x128xbf16>, vector<256x128xf32> -> vector<256x128xf32>
    %3 = arith.truncf %2 : vector<256x128xf32> to vector<256x128xbf16>
    %c0_3 = arith.constant 0 : index
    %c0_4 = arith.constant 0 : index
    %4 = vector.load %arg3[%c0_3, %c0_4] : memref<256x128xbf16, #tpu.memory_space<vmem>>, vector<256x128xbf16>
    tpu.vector_store %arg3[%c0_3, %c0_4], %3 {strides = array<i32>} : memref<256x128xbf16, #tpu.memory_space<vmem>>, vector<256x128xbf16>,
    return
  }
  func.func @transform_0(%arg0: i32) -> (i32, i32) {
    %c0_i32 = arith.constant 0 : i32
    %c0_i32_0 = arith.constant 0 : i32
    return %arg0, %c0_i32 : i32, i32
  }
  func.func @transform_1(%arg0: i32) -> (i32, i32) {
    %c0_i32 = arith.constant 0 : i32
    %c0_i32_0 = arith.constant 0 : i32
    %c0_i32_1 = arith.constant 0 : i32
    return %c0_i32, %c0_i32_0 : i32, i32
  }
  func.func @transform_2(%arg0: i32) -> (i32, i32) {
    %c0_i32 = arith.constant 0 : i32
    %c0_i32_0 = arith.constant 0 : i32
    return %arg0, %c0_i32 : i32, i32
  }
}

</mosaic_0001>

<bundles_post_ra>
// kernel: tpu_custom_call.1
= control target key start
LH: loop header
LB: loop body
LE: loop exit
PB: predicated region body
PF: predicated region fallthrough
CT: control target
= control target key end

     0   :  { %vm141_vm0 = vcmask 261120   ;;  %s923_s0 = inlined_call_operand.vmem [shape: bf16[256,32], index: 0, kind: input, shape index: {}]   ;;  %s924_s1 = inlined_call_operand.vmem [shape: bf16[32,128], index: 1, kind: input, shape index: {}]   ;;  %s925_s2 = inlined_call_operand.hbm [shape: bf16[256,128], index: 2, kind: output, shape index: {}]  }
   0x1   :  { %v781_v0 = vld [vmem:[%s924_s1] sm:$0xff]   ;;  %v782_v1 = vld [vmem:[%s924_s1 + $0x8] sm:$0xff]   ;;  %v787_v6 = vld [vmem:[%s923_s0 + $0x10] sm:$0xff]  }
   0x2   :  { %738 = vmatprep.subr.bf16.mxu0 %v781_v0  ;;  %774 = vmatprep.subr.bf16.mxu1 %v781_v0  ;;  %v783_v2 = vld [vmem:[%s923_s0] sm:$0xff]   ;;  %v785_v4 = vld [vmem:[%s923_s0 + $0x8] sm:$0xff]   ;;  %v788_v7 = vld [vmem:[%s923_s0 + $0x50] sm:$0xff]  }
   0x3   :  { %739 = vmatpush3.bf16.msra.mxu0 %v781_v0  ;;  %776 = vmatpush3.bf16.msra.mxu1 %v781_v0  ;;  %v784_v3 = vld [vmem:[%s923_s0 + $0x40] sm:$0xff]   ;;  %v786_v5 = vld [vmem:[%s923_s0 + $0x48] sm:$0xff]   ;;  %v789_v8 = vld [vmem:[%s923_s0 + $0x18] sm:$0xff]  }
   0x4   :  { %740 = vmatprep.subr.bf16.mxu0 %v782_v1  ;;  %775 = vmatprep.subr.bf16.mxu1 %v782_v1  ;;  %v790_v9 = vld [vmem:[%s923_s0 + $0x58] sm:$0xff]   ;;  %v791_v10 = vld [vmem:[%s923_s0 + $0x20] sm:$0xff]  }
   0x5   :  { %742 = vmatprep.mubr.msk.bf16.mxu0 %vm141_vm0, %v783_v2  ;;  %758 = vmatprep.mubr.msk.bf16.mxu1 %vm141_vm0, %v784_v3  ;;  %v792_v11 = vld [vmem:[%s923_s0 + $0x60] sm:$0xff]  }
   0x7   :  { %741 = vmatpush3.bf16.msra.mxu0 %v782_v1  ;;  %777 = vmatpush3.bf16.msra.mxu1 %v782_v1 }
   0xa   :  { %743 = vmatmul.mubr.msk.bf16.vlgmr.msra.gmra.mrb[0].mxu0 %vm141_vm0, %v785_v4  ;;  %759 = vmatmul.mubr.msk.bf16.vlgmr.msra.gmra.mrb[0].mxu1 %vm141_vm0, %v786_v5 }
   0xb   :  { %746 = vmatprep.mubr.msk.bf16.mxu0 %vm141_vm0, %v787_v6  ;;  %762 = vmatprep.mubr.msk.bf16.mxu1 %vm141_vm0, %v788_v7 }
  0x12   :  { %747 = vmatmul.mubr.msk.bf16.gmra.mrb[4].mxu0 %vm141_vm0, %v789_v8  ;;  %763 = vmatmul.mubr.msk.bf16.gmra.mrb[4].mxu1 %vm141_vm0, %v790_v9 }
  0x13   :  { %7 = vsyncpa [#allocation3], 0  ;;  %750 = vmatprep.mubr.msk.bf16.mxu0 %vm141_vm0, %v791_v10  ;;  %766 = vmatprep.mubr.msk.bf16.mxu1 %vm141_vm0, %v792_v11  ;;  %v793_v12 = vld [vmem:[%s923_s0 + $0x28] sm:$0xff]   ;;  %v795_v14 = vld [vmem:[%s923_s0 + $0x30] sm:$0xff]  }
  0x14   :  { %v794_v13 = vld [vmem:[%s923_s0 + $0x68] sm:$0xff]   ;;  %v796_v15 = vld [vmem:[%s923_s0 + $0x70] sm:$0xff]   ;;  %v797_v16 = vld [vmem:[%s923_s0 + $0x38] sm:$0xff]  }
  0x15   :  { %v798_v17 = vld [vmem:[%s923_s0 + $0x78] sm:$0xff]   ;;  %s823_s0 = smov [#allocation2]  }
  0x16   :  { %s516_s16 = sshll.u32 %s823_s0, 4  ;;  %s517_s16 = int_to_ptr.vmem [resolvable:$true] %s516_s16 }
  0x17   :  { %s799_s17 = scalar_lea.vmem %s517_s16, 2048  ;;  %p804_p1 = scmp.lt.s32.totalorder %s517_s16, %s517_s16 }
  0x18   :  { %p800_p0 = scmp.ne.s32.totalorder %s517_s16, %s799_s17  ;;  %p805_p2 = scmp.lt.s32.totalorder %s799_s17, %s799_s17 }
  0x1a   :  { %751 = vmatmul.mubr.msk.bf16.gmra.mrb[8].mxu0 %vm141_vm0, %v793_v12  ;;  %767 = vmatmul.mubr.msk.bf16.gmra.mrb[8].mxu1 %vm141_vm0, %v794_v13  ;;  %p806_p3 = por %p805_p2, %p804_p1 }
  0x1b   :  { %754 = vmatprep.mubr.msk.bf16.mxu0 %vm141_vm0, %v795_v14  ;;  %770 = vmatprep.mubr.msk.bf16.mxu1 %vm141_vm0, %v796_v15 }
  0x1c   :  { %p807_p4 = pnand %p806_p3, %p800_p0 }
  0x22   :  { %755 = vmatmul.mubr.msk.bf16.gmra.mrb[12].mxu0 %vm141_vm0, %v797_v16  ;;  %771 = vmatmul.mubr.msk.bf16.gmra.mrb[12].mxu1 %vm141_vm0, %v798_v17 }
  0xdd   :  { %v744_v18 = vpop.f32.mrb[0].mxu0  ;;  %v760_v19 = vpop.f32.mrb[0].mxu1 }
  0xde   :  { %v224_v20 = vpop.f32.mrb[1].mxu0  ;;  %v288_v21 = vpop.f32.mrb[1].mxu1 }
  0xdf   :  { %v745_v22 = vpop.f32.mrb[2].mxu0  ;;  %v761_v23 = vpop.f32.mrb[2].mxu1 }
  0xe0   :  { %v633_v24 = vpack.c.bf16 %v745_v22, %v744_v18  ;;  %v673_v25 = vpack.c.bf16 %v761_v23, %v760_v19  ;;  %v227_v26 = vpop.f32.mrb[3].mxu0  ;;  %v291_v27 = vpop.f32.mrb[3].mxu1 }
  0xe1   :  { %v628_v28 = vpack.c.bf16 %v227_v26, %v224_v20  ;;  %v668_v29 = vpack.c.bf16 %v291_v27, %v288_v21 }
  0xe2   :  { %705 = vst [vmem:[#allocation2 + $0x8] sm:$0xff] %v633_v24   ;;  %713 = vst [vmem:[#allocation2 + $0x48] sm:$0xff] %v673_v25  }
  0xe3   :  { %629 = vst [vmem:[#allocation2] sm:$0xff] %v628_v28   ;;  %712 = vst [vmem:[#allocation2 + $0x40] sm:$0xff] %v668_v29  }
  0xe5   :  { %v748_v30 = vpop.f32.mrb[4].mxu0  ;;  %v764_v31 = vpop.f32.mrb[4].mxu1 }
  0xe6   :  { %v240_v32 = vpop.f32.mrb[5].mxu0  ;;  %v304_v33 = vpop.f32.mrb[5].mxu1 }
  0xe7   :  { %v749_v34 = vpop.f32.mrb[6].mxu0  ;;  %v765_v35 = vpop.f32.mrb[6].mxu1 }
  0xe8   :  { %v643_v36 = vpack.c.bf16 %v749_v34, %v748_v30  ;;  %v683_v37 = vpack.c.bf16 %v765_v35, %v764_v31  ;;  %v243_v38 = vpop.f32.mrb[7].mxu0  ;;  %v307_v39 = vpop.f32.mrb[7].mxu1 }
  0xe9   :  { %v638_v40 = vpack.c.bf16 %v243_v38, %v240_v32  ;;  %v678_v41 = vpack.c.bf16 %v307_v39, %v304_v33 }
  0xea   :  { %707 = vst [vmem:[#allocation2 + $0x18] sm:$0xff] %v643_v36   ;;  %715 = vst [vmem:[#allocation2 + $0x58] sm:$0xff] %v683_v37  }
  0xeb   :  { %706 = vst [vmem:[#allocation2 + $0x10] sm:$0xff] %v638_v40   ;;  %714 = vst [vmem:[#allocation2 + $0x50] sm:$0xff] %v678_v41  }
  0xed   :  { %v752_v42 = vpop.f32.mrb[8].mxu0  ;;  %v768_v43 = vpop.f32.mrb[8].mxu1 }
  0xee   :  { %v256_v44 = vpop.f32.mrb[9].mxu0  ;;  %v320_v45 = vpop.f32.mrb[9].mxu1 }
  0xef   :  { %v753_v46 = vpop.f32.mrb[10].mxu0  ;;  %v769_v47 = vpop.f32.mrb[10].mxu1 }
  0xf0   :  { %v653_v48 = vpack.c.bf16 %v753_v46, %v752_v42  ;;  %v693_v49 = vpack.c.bf16 %v769_v47, %v768_v43  ;;  %v259_v50 = vpop.f32.mrb[11].mxu0  ;;  %v323_v51 = vpop.f32.mrb[11].mxu1 }
  0xf1   :  { %v648_v52 = vpack.c.bf16 %v259_v50, %v256_v44  ;;  %v688_v53 = vpack.c.bf16 %v323_v51, %v320_v45 }
  0xf2   :  { %709 = vst [vmem:[#allocation2 + $0x28] sm:$0xff] %v653_v48   ;;  %717 = vst [vmem:[#allocation2 + $0x68] sm:$0xff] %v693_v49  }
  0xf3   :  { %708 = vst [vmem:[#allocation2 + $0x20] sm:$0xff] %v648_v52   ;;  %716 = vst [vmem:[#allocation2 + $0x60] sm:$0xff] %v688_v53  }
  0xf5   :  { %v756_v54 = vpop.f32.mrb[12].mxu0  ;;  %v772_v55 = vpop.f32.mrb[12].mxu1 }
  0xf6   :  { %v272_v56 = vpop.f32.mrb[13].mxu0  ;;  %v336_v57 = vpop.f32.mrb[13].mxu1 }
  0xf7   :  { %v757_v58 = vpop.f32.mrb[14].mxu0  ;;  %v773_v59 = vpop.f32.mrb[14].mxu1 }
  0xf8   :  { %v663_v60 = vpack.c.bf16 %v757_v58, %v756_v54  ;;  %v703_v61 = vpack.c.bf16 %v773_v59, %v772_v55  ;;  %v275_v62 = vpop.f32.mrb[15].mxu0  ;;  %v339_v63 = vpop.f32.mrb[15].mxu1 }
  0xf9   :  { %v658_v0 = vpack.c.bf16 %v275_v62, %v272_v56  ;;  %v698_v1 = vpack.c.bf16 %v339_v63, %v336_v57 }
  0xfa   :  { %711 = vst [vmem:[#allocation2 + $0x38] sm:$0xff] %v663_v60   ;;  %719 = vst [vmem:[#allocation2 + $0x78] sm:$0xff] %v703_v61  }
  0xfb   :  { %710 = vst [vmem:[#allocation2 + $0x30] sm:$0xff] %v658_v0   ;;  %718 = vst [vmem:[#allocation2 + $0x70] sm:$0xff] %v698_v1  }
  0xfc   :  { %810 = shalt.err (!%p807_p4)
}
  0xfd   :  { %s811_s19 = scalar_lea.hbm %s925_s2, 2048 }
  0xfe   :  { %p812_p5 = scmp.ne.s32.totalorder %s925_s2, %s811_s19  ;;  %p815_p6 = scmp.lt.u32.totalorder %s811_s19, %s925_s2 }
 0x100   :  { %p817_p7 = pnand %p815_p6, %p812_p5 }
 0x102   :  { %820 = shalt.err (!%p817_p7)
}
 0x103   :  { %s824_s24 = smov 64   ;;  %s825_s25 = smov 4  }
 0x104   :  { %522 = dma.vmem_to_hbm [thread:$0]  %s517_s16, 2048, %s925_s2, [#allocation3], %s824_s24, %s824_s24, %s825_s25  }
 0x105   :  { %821 = dma.done.wait [#allocation3], 2048  }
 0x106   :  { %822 = vsyncadd [#allocation3], 4294965248 }
 0x107   :  { %526 = vsyncpa [#allocation3], 1 }

</bundles_post_ra>
